<compile_context>
chip_gen: v6e
topology: v6e:2x2x1
jax: 0.10.0
libtpu: 0.0.40
codegen_flags: <defaults>
</compile_context>

<pallas_src>
import math

import jax
import jax.numpy as jnp
from jax.experimental import pallas as pl
from jax.experimental.pallas import tpu as pltpu


_LANE = 128                              # TPU lane width (last dim of a vreg)
_SUBLANE = 8                             # sublane granularity (second-to-last dim)
_TARGET_TILE_BYTES = 4 * 1024 * 1024     # per-buffer tile target (~16 MiB double-buffered)
_VMEM_LIMIT_BYTES = 32 * 1024 * 1024     # explicit scoped-VMEM cap (bumps v5e's 16 MiB default)

# v7x only: shard row tiles across the two TensorCores.  Left False by default so the
# script runs unchanged on single-TC v5e/v6e.
_USE_CORE_PARALLEL = False


def _build_pe_table(d_model: int, max_len: int) -> jnp.ndarray:
    """Deterministic sinusoidal table, shape (max_len, d_model), float32."""
    assert d_model % 2 == 0, "PositionalEncoding requires an even d_model"
    position = jnp.arange(0, max_len, dtype=jnp.float32)[:, None]            # (L, 1)
    div_term = jnp.exp(
        jnp.arange(0, d_model, 2, dtype=jnp.float32) * (-math.log(10000.0) / d_model)
    )                                                                         # (D/2,)
    sin = jnp.sin(position * div_term)                                        # (L, D/2)
    cos = jnp.cos(position * div_term)                                        # (L, D/2)
    # Interleave: pe[:, 0::2] = sin, pe[:, 1::2] = cos
    pe = jnp.stack([sin, cos], axis=-1).reshape(max_len, d_model)
    return pe


def _pe_add_kernel(x_ref, pe_ref, o_ref):
    # x_ref/o_ref: (tR, tL) lane-dense tile; pe_ref: (1, tL) row (resident per column
    # stripe).  Sublane-broadcast + add on the VPU; stores are unmasked full-lane vst.
    o_ref[...] = x_ref[...] + pe_ref[...]


def _pick_col_tile(L: int, itemsize: int, budget: int) -> int:
    """Lane-axis tile (multiple of 128).  Almost always returns L; only splits when a
    single 8-row stripe would exceed the per-buffer budget (huge d_model guard)."""
    max_cols = max(_LANE, (budget // (_SUBLANE * itemsize)) // _LANE * _LANE)
    if L <= max_cols:
        return L
    for cand in range(max_cols, max(_LANE, max_cols // 2) - 1, -_LANE):
        if L % cand == 0:
            return cand
    return max_cols


def _pick_row_tile(R: int, bytes_per_row: int, budget: int) -> int:
    """Row tile: multiple of 8, near the byte budget, preferring one that divides R so
    the last grid block is not a masked partial store."""
    max_rows = max(_SUBLANE, (budget // bytes_per_row) // _SUBLANE * _SUBLANE)
    if R <= max_rows:
        return R
    for cand in range(max_rows, max(_SUBLANE, max_rows // 2) - 1, -_SUBLANE):
        if R % cand == 0:
            return cand
    return max_rows


def positional_encoding_forward(x: jnp.ndarray, pe_table: jnp.ndarray) -> jnp.ndarray:
    """x: (B, S, D).  Adds pe_table[S] (a single row) to every (b, s) position of x."""
    B, S, D = x.shape
    max_len = pe_table.shape[0]
    if not (0 <= S < max_len):
        # Matches PyTorch: pe[:, seq_len, :] would raise for seq_len >= max_len.
        raise ValueError(f"seq_len={S} must be < max_len={max_len}")

    # Single pe row at index == seq_len, cast to x.dtype so the in-kernel add is
    # same-dtype (keeps bf16 vreg packing).  NOTE: PyTorch would promote a half x to
    # f32 here; numerically negligible, kept in x.dtype for bandwidth.
    pe_row = pe_table[S:S + 1, :].astype(x.dtype)                             # (1, D)

    n_elems = B * S * D
    L = (D * _LANE) // math.gcd(D, _LANE)                                     # lcm(D, 128)

    if n_elems % L != 0:
        # Rare shape: no lane-dense flattening exists.  A pallas path here would either
        # mask every store (~4x store-path penalty) or materialize an extra copy of x
        # (pallas_call is a fusion barrier), so let XLA fuse the plain broadcast add.
        return x + pe_row.reshape(1, 1, D)

    R = n_elems // L
    x2d = x.reshape(R, L)                  # each row holds L/D complete d_model vectors
    pe2d = jnp.tile(pe_row, (1, L // D))   # (1, L): per-row constant pe pattern

    itemsize = jnp.dtype(x.dtype).itemsize
    tL = _pick_col_tile(L, itemsize, _TARGET_TILE_BYTES)
    tR = _pick_row_tile(R, tL * itemsize, _TARGET_TILE_BYTES)
    grid = (pl.cdiv(R, tR), pl.cdiv(L, tL))

    if _USE_CORE_PARALLEL:
        dim_sems = (pltpu.CORE_PARALLEL, pltpu.ARBITRARY)   # v7x: real 2-TC split
    else:
        dim_sems = (pltpu.PARALLEL, pltpu.ARBITRARY)

    out2d = pl.pallas_call(
        _pe_add_kernel,
        out_shape=jax.ShapeDtypeStruct((R, L), x.dtype),
        grid_spec=pltpu.PrefetchScalarGridSpec(
            num_scalar_prefetch=0,
            grid=grid,
            in_specs=[
                pl.BlockSpec((tR, tL), lambda r, c: (r, c)),
                pl.BlockSpec((1, tL), lambda r, c: (0, c)),   # resident pe row stripe
            ],
            out_specs=pl.BlockSpec((tR, tL), lambda r, c: (r, c)),
        ),
        compiler_params=pltpu.CompilerParams(
            dimension_semantics=dim_sems,
            vmem_limit_bytes=_VMEM_LIMIT_BYTES,
        ),
        cost_estimate=pl.CostEstimate(
            flops=n_elems,
            transcendentals=0,
            bytes_accessed=2 * n_elems * itemsize + L * itemsize,
        ),
        # input_output_aliases intentionally omitted (needs jit-level donation of x to
        # avoid a defensive copy; see header notes).
    )(x2d, pe2d)

    # TODO(synk): training-mode dropout (p=0.1) not implemented; when added, fuse it
    # into _pe_add_kernel via pltpu.prng_seed + pltpu.prng_random_bits instead of a
    # second HBM pass.  Eval-mode dropout is identity.
    return out2d.reshape(B, S, D)


if __name__ == "__main__":
    key = jax.random.PRNGKey(0)
    B, S, D = 2, 8, 32          # batch=2, seq=8, d_model=32
    max_len = 128               # table only needs to cover index S

    x = jax.random.normal(key, (B, S, D), dtype=jnp.float32)
    pe_table = _build_pe_table(D, max_len)

    fwd = jax.jit(positional_encoding_forward)
    out = jax.block_until_ready(fwd(x, pe_table))

    # Reference check in plain JAX (same semantics as the PyTorch forward in eval mode):
    # a single pe row at index == seq_len broadcast over (batch, seq).
    ref = x + pe_table[S][None, None, :]
    assert out.shape == x.shape and out.dtype == x.dtype
    assert jnp.allclose(out, ref, atol=1e-6), "mismatch vs reference"

    print("KERNEL_OK")
</pallas_src>

<mosaic_0001>
module attributes {stable_mosaic.version = 11 : i64} {
  func.func @_pe_add_kernel(%arg0: i32, %arg1: i32, %arg2: memref<4x128xf32, #tpu.memory_space<vmem>>, %arg3: memref<1x128xf32, #tpu.memory_space<vmem>>, %arg4: memref<4x128xf32, #tpu.memory_space<vmem>>) attributes {dimension_semantics = [#tpu.dimension_semantics<parallel>, #tpu.dimension_semantics<arbitrary>], iteration_bounds = array<i64: 1, 1>, scalar_prefetch = 0 : i64, scratch_operands = 0 : i64, tpu.core_type = #tpu.core_type<tc>, window_params = [{transform_indices = @transform_0, window_bounds = array<i64: 4, 128>}, {transform_indices = @transform_1, window_bounds = array<i64: 1, 128>}, {transform_indices = @transform_2, window_bounds = array<i64: 4, 128>}]} {
    %c0 = arith.constant 0 : index
    %c0_0 = arith.constant 0 : index
    %0 = vector.load %arg2[%c0, %c0_0] : memref<4x128xf32, #tpu.memory_space<vmem>>, vector<4x128xf32>
    %c0_1 = arith.constant 0 : index
    %c0_2 = arith.constant 0 : index
    %1 = vector.load %arg3[%c0_1, %c0_2] : memref<1x128xf32, #tpu.memory_space<vmem>>, vector<1x128xf32>
    %2 = vector.broadcast %1 : vector<1x128xf32> to vector<4x128xf32>
    %3 = arith.addf %0, %2 : vector<4x128xf32>
    %c0_3 = arith.constant 0 : index
    %c0_4 = arith.constant 0 : index
    %4 = vector.load %arg4[%c0_3, %c0_4] : memref<4x128xf32, #tpu.memory_space<vmem>>, vector<4x128xf32>
    tpu.vector_store %arg4[%c0_3, %c0_4], %3 {strides = array<i32>} : memref<4x128xf32, #tpu.memory_space<vmem>>, vector<4x128xf32>,
    return
  }
  func.func @transform_0(%arg0: i32, %arg1: i32) -> (i32, i32) {
    %c0_i32 = arith.constant 0 : i32
    return %arg0, %arg1 : i32, i32
  }
  func.func @transform_1(%arg0: i32, %arg1: i32) -> (i32, i32) {
    %c0_i32 = arith.constant 0 : i32
    %c0_i32_0 = arith.constant 0 : i32
    return %c0_i32, %arg1 : i32, i32
  }
  func.func @transform_2(%arg0: i32, %arg1: i32) -> (i32, i32) {
    %c0_i32 = arith.constant 0 : i32
    return %arg0, %arg1 : i32, i32
  }
}

</mosaic_0001>

<bundles_post_ra>
// kernel: positional_encoding_forward.1
= control target key start
LH: loop header
LB: loop body
LE: loop exit
PB: predicated region body
PF: predicated region fallthrough
CT: control target
= control target key end

     0   :  { %s50_s0 = inlined_call_operand.vmem [shape: f32[4,128], index: 0, kind: input, shape index: {}]   ;;  %s51_s1 = inlined_call_operand.vmem [shape: f32[1,128], index: 1, kind: input, shape index: {}]   ;;  %s52_s2 = inlined_call_operand.vmem [shape: f32[4,128], index: 2, kind: output, shape index: {}]  }
   0x1   :  { %v11_v0 = vld [vmem:[%s50_s0] sm:$0xf] }
   0x2   :  { %v25_v1 = vld [vmem:[%s51_s1] ss:$0 sm:$0xff] }
   0x3   :  { %v19_v2 = vadd.f32 %v25_v1, %v11_v0 }
   0x5   :  { %20 = vst [vmem:[%s52_s2] sm:$0xf] %v19_v2 }

</bundles_post_ra>
